<compile_context>
chip_gen: v7x
topology: tpu7x:2x2x1
jax: 0.10.0
libtpu: 0.0.40
codegen_flags: <defaults>
</compile_context>

<pallas_src>
import jax
import jax.numpy as jnp
from jax.experimental import pallas as pl
from jax.experimental.pallas import tpu as pltpu


def _round_up(n, m):
    return pl.cdiv(n, m) * m


def mlp_kernel(x_ref, w1_ref, b1_ref, w2_ref, b2_ref, w3_ref, b3_ref, o_ref):
    # Feature-major layout: the batch lives in the lane (last, 128-wide) axis,
    # so all loads/stores are lane-dense and PyTorch-native (out, in) weights
    # are used directly (y_t = W @ x_t + b[:, None]).
    w_dt = w1_ref.dtype
    x = x_ref[...].astype(w_dt)                     # (7, TB)

    # fc1 + ReLU -> (14, TB); f32 accumulate, f32 bias-add / ReLU.
    h1 = jnp.dot(w1_ref[...], x, preferred_element_type=jnp.float32) + b1_ref[...]
    h1 = jnp.maximum(h1, 0.0)

    # fc2 + ReLU -> (14, TB)
    h2 = (jnp.dot(w2_ref[...], h1.astype(w_dt),
                  preferred_element_type=jnp.float32) + b2_ref[...])
    h2 = jnp.maximum(h2, 0.0)

    # fc3 (no activation, matches the PyTorch forward) -> (3, TB)
    out = (jnp.dot(w3_ref[...], h2.astype(w_dt),
                   preferred_element_type=jnp.float32) + b3_ref[...])
    o_ref[...] = out.astype(o_ref.dtype)


def net_forward_fm(x_fm, params, *, block_b=64 * 1024,
                   compute_dtype=jnp.bfloat16, out_dtype=jnp.float32):
    """Feature-major forward pass.

    x_fm: (7, B) activations (bf16 recommended; any float dtype accepted and
          cast to the weight dtype in-VMEM).
    params: PyTorch-convention weights, W is (out_features, in_features).
    Returns logits feature-major, shape (3, B), in `out_dtype`.
    """
    F, B = x_fm.shape
    assert F == 7, f"expected 7 input features, got {F}"

    # --- Batch-tile selection -------------------------------------------------
    b_lanes = int(_round_up(B, 128))            # lanes needed to cover the batch
    tb = min(int(block_b), b_lanes)
    if b_lanes >= 256:
        # Guarantee >= 2 grid steps when the batch allows it (v7x has 2 TCs).
        tb = min(tb, int(_round_up(pl.cdiv(b_lanes, 2), 128)))
    tb = max(128, (tb // 128) * 128)            # multiple of 128 lanes
    grid_b = int(pl.cdiv(B, tb))                # ragged last block is masked

    # --- Parameters (native PyTorch (out, in) shapes; biases stay f32) --------
    w1 = params["w1"].astype(compute_dtype)                 # (14, 7)
    w2 = params["w2"].astype(compute_dtype)                 # (14, 14)
    w3 = params["w3"].astype(compute_dtype)                 # (3, 14)
    b1 = params["b1"].astype(jnp.float32).reshape(-1, 1)    # (14, 1)
    b2 = params["b2"].astype(jnp.float32).reshape(-1, 1)    # (14, 1)
    b3 = params["b3"].astype(jnp.float32).reshape(-1, 1)    # (3, 1)

    resident = lambda shape: pl.BlockSpec(shape, lambda i: (0, 0))

    # --- Advisory cost estimate, kept in sync with tile / dtype choices -------
    x_item = jnp.dtype(x_fm.dtype).itemsize
    w_item = jnp.dtype(compute_dtype).itemsize
    o_item = jnp.dtype(out_dtype).itemsize
    b_cov = grid_b * tb                                      # lanes covered by grid
    cost = pl.CostEstimate(
        flops=2 * b_cov * (7 * 14 + 14 * 14 + 14 * 3),
        transcendentals=0,
        bytes_accessed=(b_cov * (7 * x_item + 3 * o_item)
                        + (w1.size + w2.size + w3.size) * w_item
                        + (b1.size + b2.size + b3.size) * 4),
    )

    return pl.pallas_call(
        mlp_kernel,
        out_shape=jax.ShapeDtypeStruct((3, B), out_dtype),
        grid_spec=pltpu.PrefetchScalarGridSpec(
            num_scalar_prefetch=0,
            grid=(grid_b,),
            in_specs=[
                pl.BlockSpec((7, tb), lambda i: (0, i)),   # x tile (lane-dense)
                resident(w1.shape),
                resident(b1.shape),
                resident(w2.shape),
                resident(b2.shape),
                resident(w3.shape),
                resident(b3.shape),
            ],
            out_specs=pl.BlockSpec((3, tb), lambda i: (0, i)),
        ),
        compiler_params=pltpu.CompilerParams(
            dimension_semantics=("parallel",),      # megacore sharding on v7x
            vmem_limit_bytes=32 * 1024 * 1024,      # safe on v5e/v6e/v7x
        ),
        cost_estimate=cost,
    )(x_fm, w1, b1, w2, b2, w3, b3)


def net_forward(x, params, **kwargs):
    """PyTorch-layout convenience wrapper: (B, 7) -> (B, 3).

    Prefer net_forward_fm with feature-major activations produced upstream to
    avoid the extra transpose passes on a memory-bound op.
    """
    return net_forward_fm(x.T, params, **kwargs).T


def init_params(key):
    """Deterministic synthetic parameters with PyTorch Linear shapes."""
    ks = jax.random.split(key, 6)
    w1 = jax.random.normal(ks[0], (14, 7), jnp.float32) * 0.1
    b1 = jax.random.normal(ks[1], (14,), jnp.float32) * 0.1
    w2 = jax.random.normal(ks[2], (14, 14), jnp.float32) * 0.1
    b2 = jax.random.normal(ks[3], (14,), jnp.float32) * 0.1
    w3 = jax.random.normal(ks[4], (3, 14), jnp.float32) * 0.1
    b3 = jax.random.normal(ks[5], (3,), jnp.float32) * 0.1
    return {"w1": w1, "b1": b1, "w2": w2, "b2": b2, "w3": w3, "b3": b3}


def reference_forward(x, p):
    """Pure-JAX reference matching PyTorch semantics exactly."""
    h = jnp.maximum(x @ p["w1"].T + p["b1"], 0.0)
    h = jnp.maximum(h @ p["w2"].T + p["b2"], 0.0)
    return h @ p["w3"].T + p["b3"]


if __name__ == "__main__":
    key = jax.random.PRNGKey(0)
    kx, kx2, kp = jax.random.split(key, 3)
    params = init_params(kp)

    # 1) Small batch, PyTorch layout, f32 weights: must match reference tightly.
    B = 8
    x = jax.random.normal(kx, (B, 7), jnp.float32)
    ref = reference_forward(x, params)
    out_f32 = jax.block_until_ready(
        net_forward(x, params, compute_dtype=jnp.float32))
    assert out_f32.shape == (B, 3), out_f32.shape
    assert jnp.allclose(out_f32, ref, atol=1e-5, rtol=1e-5), \
        "Pallas kernel (f32) output mismatch vs reference"

    # 2) Recommended path: feature-major bf16 activation streaming, bf16 weights
    #    (default), f32 accumulation / bias / ReLU.  Looser tolerance than
    #    PyTorch-autocast-style mixed precision since activations are bf16 too.
    x_fm_bf16 = x.T.astype(jnp.bfloat16)                       # (7, B)
    out_fm = jax.block_until_ready(net_forward_fm(x_fm_bf16, params))
    assert out_fm.shape == (3, B), out_fm.shape
    assert jnp.allclose(out_fm.T, ref, atol=2e-2, rtol=2e-2), \
        "Pallas kernel (bf16) output mismatch vs reference"

    # 3) Ragged batch exercising >= 2 grid steps and masked last block, f32.
    B2 = 300                                                    # -> tb=256, grid=2
    x2 = jax.random.normal(kx2, (B2, 7), jnp.float32)
    ref2 = reference_forward(x2, params)
    out2 = jax.block_until_ready(
        net_forward_fm(x2.T, params, compute_dtype=jnp.float32))
    assert out2.shape == (3, B2), out2.shape
    assert jnp.allclose(out2.T, ref2, atol=1e-5, rtol=1e-5), \
        "Pallas kernel (ragged, multi-step grid) output mismatch vs reference"

    print("KERNEL_OK")
</pallas_src>

<mosaic_0001>
module attributes {stable_mosaic.version = 11 : i64} {
  func.func @mlp_kernel(%arg0: i32, %arg1: memref<7x128xf32, #tpu.memory_space<vmem>>, %arg2: memref<14x7xf32, #tpu.memory_space<vmem>>, %arg3: memref<14x1xf32, #tpu.memory_space<vmem>>, %arg4: memref<14x14xf32, #tpu.memory_space<vmem>>, %arg5: memref<14x1xf32, #tpu.memory_space<vmem>>, %arg6: memref<3x14xf32, #tpu.memory_space<vmem>>, %arg7: memref<3x1xf32, #tpu.memory_space<vmem>>, %arg8: memref<3x128xf32, #tpu.memory_space<vmem>>) attributes {dimension_semantics = [#tpu.dimension_semantics<parallel>], iteration_bounds = array<i64: 1>, scalar_prefetch = 0 : i64, scratch_operands = 0 : i64, tpu.core_type = #tpu.core_type<tc>, window_params = [{transform_indices = @transform_0, window_bounds = array<i64: 7, 128>}, {pipeline_mode = #tpu.pipeline_mode<synchronous>, transform_indices = @transform_1, window_bounds = array<i64: 14, 7>}, {pipeline_mode = #tpu.pipeline_mode<synchronous>, transform_indices = @transform_2, window_bounds = array<i64: 14, 1>}, {pipeline_mode = #tpu.pipeline_mode<synchronous>, transform_indices = @transform_3, window_bounds = array<i64: 14, 14>}, {pipeline_mode = #tpu.pipeline_mode<synchronous>, transform_indices = @transform_4, window_bounds = array<i64: 14, 1>}, {pipeline_mode = #tpu.pipeline_mode<synchronous>, transform_indices = @transform_5, window_bounds = array<i64: 3, 14>}, {pipeline_mode = #tpu.pipeline_mode<synchronous>, transform_indices = @transform_6, window_bounds = array<i64: 3, 1>}, {transform_indices = @transform_7, window_bounds = array<i64: 3, 128>}]} {
    %c0 = arith.constant 0 : index
    %c0_0 = arith.constant 0 : index
    %0 = vector.load %arg1[%c0, %c0_0] : memref<7x128xf32, #tpu.memory_space<vmem>>, vector<7x128xf32>
    %c0_1 = arith.constant 0 : index
    %c0_2 = arith.constant 0 : index
    %1 = vector.load %arg2[%c0_1, %c0_2] : memref<14x7xf32, #tpu.memory_space<vmem>>, vector<14x7xf32>
    %cst = arith.constant dense<0.000000e+00> : vector<14x128xf32>
    %2 = tpu.matmul %1, %0, %cst {dimension_numbers = #tpu.dot_dimension_numbers<[1], [0], [0], [1], [0, 0, 1, 1], [], []>} : vector<14x7xf32>, vector<7x128xf32>, vector<14x128xf32> -> vector<14x128xf32>
    %c0_3 = arith.constant 0 : index
    %c0_4 = arith.constant 0 : index
    %3 = vector.load %arg3[%c0_3, %c0_4] : memref<14x1xf32, #tpu.memory_space<vmem>>, vector<14x1xf32>
    %4 = vector.broadcast %3 : vector<14x1xf32> to vector<14x128xf32>
    %5 = arith.addf %2, %4 : vector<14x128xf32>
    %cst_5 = arith.constant 0.000000e+00 : f32
    %6 = vector.broadcast %cst_5 : f32 to vector<14x128xf32>
    %7 = arith.maximumf %5, %6 : vector<14x128xf32>
    %c0_6 = arith.constant 0 : index
    %c0_7 = arith.constant 0 : index
    %8 = vector.load %arg4[%c0_6, %c0_7] : memref<14x14xf32, #tpu.memory_space<vmem>>, vector<14x14xf32>
    %cst_8 = arith.constant dense<0.000000e+00> : vector<14x128xf32>
    %9 = tpu.matmul %8, %7, %cst_8 {dimension_numbers = #tpu.dot_dimension_numbers<[1], [0], [0], [1], [0, 0, 1, 1], [], []>} : vector<14x14xf32>, vector<14x128xf32>, vector<14x128xf32> -> vector<14x128xf32>
    %c0_9 = arith.constant 0 : index
    %c0_10 = arith.constant 0 : index
    %10 = vector.load %arg5[%c0_9, %c0_10] : memref<14x1xf32, #tpu.memory_space<vmem>>, vector<14x1xf32>
    %11 = vector.broadcast %10 : vector<14x1xf32> to vector<14x128xf32>
    %12 = arith.addf %9, %11 : vector<14x128xf32>
    %cst_11 = arith.constant 0.000000e+00 : f32
    %13 = vector.broadcast %cst_11 : f32 to vector<14x128xf32>
    %14 = arith.maximumf %12, %13 : vector<14x128xf32>
    %c0_12 = arith.constant 0 : index
    %c0_13 = arith.constant 0 : index
    %15 = vector.load %arg6[%c0_12, %c0_13] : memref<3x14xf32, #tpu.memory_space<vmem>>, vector<3x14xf32>
    %cst_14 = arith.constant dense<0.000000e+00> : vector<3x128xf32>
    %16 = tpu.matmul %15, %14, %cst_14 {dimension_numbers = #tpu.dot_dimension_numbers<[1], [0], [0], [1], [0, 0, 1, 1], [], []>} : vector<3x14xf32>, vector<14x128xf32>, vector<3x128xf32> -> vector<3x128xf32>
    %c0_15 = arith.constant 0 : index
    %c0_16 = arith.constant 0 : index
    %17 = vector.load %arg7[%c0_15, %c0_16] : memref<3x1xf32, #tpu.memory_space<vmem>>, vector<3x1xf32>
    %18 = vector.broadcast %17 : vector<3x1xf32> to vector<3x128xf32>
    %19 = arith.addf %16, %18 : vector<3x128xf32>
    %c0_17 = arith.constant 0 : index
    %c0_18 = arith.constant 0 : index
    %20 = vector.load %arg8[%c0_17, %c0_18] : memref<3x128xf32, #tpu.memory_space<vmem>>, vector<3x128xf32>
    tpu.vector_store %arg8[%c0_17, %c0_18], %19 {strides = array<i32>} : memref<3x128xf32, #tpu.memory_space<vmem>>, vector<3x128xf32>,
    return
  }
  func.func @transform_0(%arg0: i32) -> (i32, i32) {
    %c0_i32 = arith.constant 0 : i32
    %c0_i32_0 = arith.constant 0 : i32
    return %c0_i32, %arg0 : i32, i32
  }
  func.func @transform_1(%arg0: i32) -> (i32, i32) {
    %c0_i32 = arith.constant 0 : i32
    %c0_i32_0 = arith.constant 0 : i32
    %c0_i32_1 = arith.constant 0 : i32
    return %c0_i32, %c0_i32_0 : i32, i32
  }
  func.func @transform_2(%arg0: i32) -> (i32, i32) {
    %c0_i32 = arith.constant 0 : i32
    %c0_i32_0 = arith.constant 0 : i32
    %c0_i32_1 = arith.constant 0 : i32
    return %c0_i32, %c0_i32_0 : i32, i32
  }
  func.func @transform_3(%arg0: i32) -> (i32, i32) {
    %c0_i32 = arith.constant 0 : i32
    %c0_i32_0 = arith.constant 0 : i32
    %c0_i32_1 = arith.constant 0 : i32
    return %c0_i32, %c0_i32_0 : i32, i32
  }
  func.func @transform_4(%arg0: i32) -> (i32, i32) {
    %c0_i32 = arith.constant 0 : i32
    %c0_i32_0 = arith.constant 0 : i32
    %c0_i32_1 = arith.constant 0 : i32
    return %c0_i32, %c0_i32_0 : i32, i32
  }
  func.func @transform_5(%arg0: i32) -> (i32, i32) {
    %c0_i32 = arith.constant 0 : i32
    %c0_i32_0 = arith.constant 0 : i32
    %c0_i32_1 = arith.constant 0 : i32
    return %c0_i32, %c0_i32_0 : i32, i32
  }
  func.func @transform_6(%arg0: i32) -> (i32, i32) {
    %c0_i32 = arith.constant 0 : i32
    %c0_i32_0 = arith.constant 0 : i32
    %c0_i32_1 = arith.constant 0 : i32
    return %c0_i32, %c0_i32_0 : i32, i32
  }
  func.func @transform_7(%arg0: i32) -> (i32, i32) {
    %c0_i32 = arith.constant 0 : i32
    %c0_i32_0 = arith.constant 0 : i32
    return %c0_i32, %arg0 : i32, i32
  }
}

</mosaic_0001>

<bundles_post_ra>
// kernel: tpu_custom_call.1
= control target key start
LH: loop header
LB: loop body
LE: loop exit
PB: predicated region body
PF: predicated region fallthrough
CT: control target
= control target key end

     0   :  { %vm49_vm0 = vcmask 1046528   ;;  %vm42_vm1 = vcmask 56320   ;;  %v409_v4 = vmov 0   ;;  %s513_s0 = inlined_call_operand.vmem [shape: f32[7,8], index: 0, kind: input, shape index: {}]   ;;  %s514_s1 = inlined_call_operand.vmem [shape: f32[14,7], index: 1, kind: input, shape index: {}]   ;;  %s515_s2 = inlined_call_operand.vmem [shape: f32[14,1], index: 2, kind: input, shape index: {}]   ;;  %s516_s3 = inlined_call_operand.vmem [shape: f32[14,14], index: 3, kind: input, shape index: {}]   ;;  %s517_s4 = inlined_call_operand.vmem [shape: f32[14,1], index: 4, kind: input, shape index: {}]   ;;  %s518_s5 = inlined_call_operand.vmem [shape: f32[3,14], index: 5, kind: input, shape index: {}]   ;;  %s519_s6 = inlined_call_operand.vmem [shape: f32[3,1], index: 6, kind: input, shape index: {}]   ;;  %s520_s7 = inlined_call_operand.hbm [shape: f32[3,8], index: 7, kind: output, shape index: {}]  }
   0x1   :  { %v27_v0 = vld [vmem:[%s513_s0] sm:$0x7f]  ;;  %v29_v2 = vld [vmem:[%s514_s1 + $0x8] sm:$0x3f]  ;;  %383 = vset.pattern.permute.xlu0 %v409_v4 }
   0x2   :  { %v28_v1 = vld [vmem:[%s514_s1] sm:$0xff]  ;;  %348 = vmatprep.subr.msk.mxu0 %vm49_vm0, %v27_v0 }
   0x3   :  { %350 = vmatprep.mubr.msk.f32.mxu0 %vm42_vm1, %v28_v1  ;;  %v30_v3 = vld [vmem:[%s515_s2] sm:$0xff]  ;;  %349 = vmatpush3.msk.msra.mxu0 %vm49_vm0, %v27_v0 }
   0x4   :  { %12 = vsyncpa [#allocation3], 0  ;;  %351 = vmatmul.mubr.msk.f32.vlgmr.msra.gmra.mrb[0].mxu0 %vm42_vm1, %v29_v2  ;;  %34 = vperm.xlu0 %383, %v30_v3   ;;  %v31_v5 = vld [vmem:[%s515_s2 + $0x8] sm:$0x3f]  ;;  %v233_v6 = vld [vmem:[%s519_s6] sm:$0x7] }
   0x5   :  { %384 = vset.pattern.permute.xlu1 %v409_v4  ;;  %v130_v7 = vld [vmem:[%s516_s3] sm:$0xff]  ;;  %vm144_vm2 = vcmask 113664   ;;  %v133_v9 = vld [vmem:[%s517_s4 + $0x8] sm:$0x3f]  ;;  %vm151_vm3 = vcmask 1045504   ;;  %vm410_vm4 = vmmov 1  }
   0x6   :  { %357 = vmatprep.mubr.msk.f32.mxu1 %vm144_vm2, %v130_v7  ;;  %v132_v8 = vld [vmem:[%s517_s4] sm:$0xff]  ;;  %vm483_vm5 = vmpackc.low %vm151_vm3, %vm410_vm4  ;;  %v131_v20 = vld [vmem:[%s516_s3 + $0x8] sm:$0x3f]  ;;  %v411_v21 = vmov 0.0|0.0   ;;  %vm412_vm6 = vmmov 0   ;;  %v413_v22 = vmov 0.0  }
   0x7   :  { %136 = vperm.xlu1 %384, %v132_v8   ;;  %373 = vmatprep.subr.bf16.mxu0 %v411_v21  ;;  %v232_v32 = vld [vmem:[%s518_s5] sm:$0x7]  ;;  %s414_s17 = smov [#allocation2]  }
   0x8   :  { %39 = vperm.xlu0 %383, %v31_v5   ;;  %364 = vmatprep.mubr.msk.f32.mxu0 %vm412_vm6, %v413_v22  ;;  %s322_s18 = sshll.u32 %s414_s17, 4  ;;  %s323_s18 = int_to_ptr.vmem [resolvable:$true] %s322_s18 }
   0x9   :  { %s385_s19 = scalar_lea.vmem %s323_s18, 64  ;;  %p390_p1 = scmp.lt.s32.totalorder %s323_s18, %s323_s18 }
   0xa   :  { %p386_p0 = scmp.ne.s32.totalorder %s323_s18, %s385_s19  ;;  %p391_p2 = scmp.lt.s32.totalorder %s385_s19, %s385_s19 }
   0xb   :  { %141 = vperm.xlu1 %384, %v133_v9  }
   0xc   :  { %236 = vperm.xlu0 %383, %v233_v6   ;;  %p392_p3 = por %p391_p2, %p390_p1 }
   0xe   :  { %p393_p4 = pnand %p392_p3, %p386_p0 }
  0x83   :  { %v35_v10 = vpop.permute.xlu0 %34 }
  0x86   :  { %v137_v23 = vpop.permute.xlu1 %136 }
  0x87   :  { %v40_v11 = vpop.permute.xlu0 %39 }
  0x8a   :  { %v142_v24 = vpop.permute.xlu1 %141 }
  0x8b   :  { %v237_v33 = vpop.permute.xlu0 %236 }
  0xd7   :  { %v352_v12 = vpop.f32.mrb[0].mxu0 }
  0xd8   :  { %v125_v13 = vadd.f32 %v352_v12, %v40_v11  ;;  %v119_v14 = vpop.f32.mrb[1].mxu0 }
  0xd9   :  { %v120_v15 = vadd.f32 %v119_v14, %v35_v10 }
  0xda   :  { %v129_v16 = vmax.f32 %v125_v13, 0.0 }
  0xdb   :  { %v128_v17 = vmax.f32 %v120_v15, 0.0 }
  0xdd   :  { %v367_v19 = vpack.c.bf16 %v129_v16, %v128_v17 }
  0xdf   :  { %369 = vmatprep.subr.msk.bf16.mxu1 %vm483_vm5, %v367_v19 }
  0xe0   :  { %372 = vmatpush3.bf16.msk.msra.mxu1 %vm483_vm5, %v367_v19 }
  0xe3   :  { %358 = vmatmul.mubr.msk.f32.vlgmr.msra.gmra.mrb[0].mxu1 %vm144_vm2, %v131_v20 }
 0x1b6   :  { %v359_v25 = vpop.f32.mrb[0].mxu1 }
 0x1b7   :  { %v227_v26 = vadd.f32 %v359_v25, %v142_v24  ;;  %v221_v27 = vpop.f32.mrb[1].mxu1 }
 0x1b8   :  { %v222_v28 = vadd.f32 %v221_v27, %v137_v23 }
 0x1b9   :  { %v231_v29 = vmax.f32 %v227_v26, 0.0 }
 0x1ba   :  { %v230_v30 = vmax.f32 %v222_v28, 0.0 }
 0x1bc   :  { %v374_v31 = vpack.c.bf16 %v231_v29, %v230_v30 }
 0x1be   :  { %376 = vmatpush3.bf16.msk.msra.mxu0 %vm483_vm5, %v374_v31 }
 0x1c1   :  { %365 = vmatmul.mubr.msk.f32.vlgmr.msra.gmra.mrb[2].mxu0 %vm144_vm2, %v232_v32 }
 0x294   :  { %v311_v34 = vpop.f32.mrb[2].mxu0 }
 0x295   :  { %v312_v35 = vadd.f32 %v311_v34, %v237_v33  ;;  %v366_v36 = vpop.f32.mrb[3].mxu0 }
 0x297   :  { %315 = vst [vmem:[#allocation2] sm:$0x7] %v312_v35 }
 0x298   :  { %396 = shalt.err (!%p393_p4)
}
 0x299   :  { %s397_s5 = scalar_lea.hbm %s520_s7, 64 }
 0x29a   :  { %p398_p5 = scmp.ne.s32.totalorder %s520_s7, %s397_s5  ;;  %p401_p6 = scmp.lt.u32.totalorder %s397_s5, %s520_s7 }
 0x29c   :  { %p403_p7 = pnand %p401_p6, %p398_p5 }
 0x29e   :  { %406 = shalt.err (!%p403_p7)
}
 0x29f   :  { %325 = dma.vmem_to_hbm [thread:$0]  %s323_s18, 64, %s520_s7, [#allocation3]  }
 0x2a0   :  { %407 = dma.done.wait [#allocation3], 64  }
 0x2a1   :  { %408 = vsyncadd [#allocation3], 4294967232 }
 0x2a2   :  { %329 = vsyncpa [#allocation3], 1 }

</bundles_post_ra>
